<compile_context>
chip_gen: v5e
topology: v5e:2x2
jax: 0.10.0
libtpu: 0.0.40
codegen_flags: <defaults>
</compile_context>

<pallas_src>
import math

import jax
import jax.numpy as jnp
from jax.experimental import pallas as pl
from jax.experimental.pallas import tpu as pltpu


def _row_tile(m, max_tile):
    """Largest row-tile <= max_tile that divides m (multiple of 8 when m is)."""
    if m <= max_tile:
        return m
    t = max_tile - (max_tile % 8)
    while t >= 8:
        if m % t == 0:
            return t
        t -= 8
    return m  # fallback: single block


# ----------------------------------------------------------------------------
# Kernel A: fused QKV projection + multi-head attention + combine + residual
# ----------------------------------------------------------------------------
def _attention_kernel(n_heads, head_dim):
    inv_sqrt_d = 1.0 / math.sqrt(head_dim)

    def kernel(x_ref, wq_ref, wk_ref, wv_ref, wo_ref, bo_ref, o_ref):
        x = x_ref[0].astype(jnp.float32)                      # (N, D)
        q = jnp.dot(x, wq_ref[...], preferred_element_type=jnp.float32)
        k = jnp.dot(x, wk_ref[...], preferred_element_type=jnp.float32)
        v = jnp.dot(x, wv_ref[...], preferred_element_type=jnp.float32)

        n, d = x.shape
        acc = jnp.zeros((n, d), jnp.float32)
        for h in range(n_heads):                              # static unroll
            sl = slice(h * head_dim, (h + 1) * head_dim)
            qh = q[:, sl]                                     # (N, dh)
            kh = k[:, sl]
            vh = v[:, sl]
            # scores (N, N): contract on head_dim without explicit transpose
            s = jax.lax.dot_general(
                qh, kh, (((1,), (1,)), ((), ())),
                preferred_element_type=jnp.float32) * inv_sqrt_d
            # TODO(synk): optional additive attention mask (mask=None path only)
            s = s - jnp.max(s, axis=-1, keepdims=True)
            e = jnp.exp(s)
            p = e / jnp.sum(e, axis=-1, keepdims=True)
            ah = jnp.dot(p, vh, preferred_element_type=jnp.float32)   # (N, dh)
            # head-concat + combine matmul folded into a partial matmul
            acc = acc + jnp.dot(ah, wo_ref[sl, :],
                                preferred_element_type=jnp.float32)

        out = x + acc + bo_ref[...]
        o_ref[0] = out.astype(o_ref.dtype)

    return kernel


def attention_block(x, wq, wk, wv, wo, bo, n_heads):
    B, N, D = x.shape
    head_dim = D // n_heads
    const = lambda b: (0, 0)
    return pl.pallas_call(
        _attention_kernel(n_heads, head_dim),
        out_shape=jax.ShapeDtypeStruct((B, N, D), x.dtype),
        grid_spec=pltpu.PrefetchScalarGridSpec(
            num_scalar_prefetch=0,
            grid=(B,),
            in_specs=[
                pl.BlockSpec((1, N, D), lambda b: (b, 0, 0)),
                pl.BlockSpec((D, D), const),
                pl.BlockSpec((D, D), const),
                pl.BlockSpec((D, D), const),
                pl.BlockSpec((D, D), const),
                pl.BlockSpec((1, D), const),
            ],
            out_specs=pl.BlockSpec((1, N, D), lambda b: (b, 0, 0)),
        ),
        compiler_params=pltpu.CompilerParams(
            dimension_semantics=("parallel",)),
    )(x, wq, wk, wv, wo, bo)


# ----------------------------------------------------------------------------
# Kernel B/D: BatchNorm1d batch statistics (training-mode forward)
# ----------------------------------------------------------------------------
def _bn_stats_kernel(m_rows, eps):
    def kernel(h_ref, mean_ref, rstd_ref, sum_ref, sq_ref):
        t = pl.program_id(0)

        @pl.when(t == 0)
        def _():
            sum_ref[...] = jnp.zeros_like(sum_ref)
            sq_ref[...] = jnp.zeros_like(sq_ref)

        x = h_ref[...].astype(jnp.float32)
        sum_ref[...] += jnp.sum(x, axis=0, keepdims=True)
        sq_ref[...] += jnp.sum(x * x, axis=0, keepdims=True)

        @pl.when(t == pl.num_programs(0) - 1)
        def _():
            inv_m = 1.0 / m_rows
            mean = sum_ref[...] * inv_m
            var = sq_ref[...] * inv_m - mean * mean        # biased variance
            mean_ref[...] = mean
            rstd_ref[...] = jax.lax.rsqrt(var + eps)

    return kernel


def bn_stats(h, eps=1e-5, max_rows_per_tile=512):
    # TODO(synk): BatchNorm running-stats buffer update (momentum) not modeled;
    # only the forward normalization with batch statistics is computed.
    M, D = h.shape
    tm = _row_tile(M, max_rows_per_tile)
    return pl.pallas_call(
        _bn_stats_kernel(M, eps),
        out_shape=(jax.ShapeDtypeStruct((1, D), jnp.float32),
                   jax.ShapeDtypeStruct((1, D), jnp.float32)),
        grid_spec=pltpu.PrefetchScalarGridSpec(
            num_scalar_prefetch=0,
            grid=(M // tm,),
            in_specs=[pl.BlockSpec((tm, D), lambda t: (t, 0))],
            out_specs=[pl.BlockSpec((1, D), lambda t: (0, 0)),
                       pl.BlockSpec((1, D), lambda t: (0, 0))],
            scratch_shapes=[pltpu.VMEM((1, D), jnp.float32),
                            pltpu.VMEM((1, D), jnp.float32)],
        ),
        compiler_params=pltpu.CompilerParams(
            dimension_semantics=("arbitrary",)),
    )(h)


# ----------------------------------------------------------------------------
# Kernel C: fused normalize (norm1) + feed-forward + residual
# ----------------------------------------------------------------------------
def _norm_ffn_kernel(h_ref, mean_ref, rstd_ref, g_ref, be_ref,
                     w1_ref, b1_ref, w2_ref, b2_ref, o_ref):
    x = h_ref[...].astype(jnp.float32)
    y = (x - mean_ref[...]) * rstd_ref[...] * g_ref[...] + be_ref[...]
    f = jnp.dot(y, w1_ref[...], preferred_element_type=jnp.float32) + b1_ref[...]
    f = jnp.maximum(f, 0.0)
    out = y + jnp.dot(f, w2_ref[...], preferred_element_type=jnp.float32) + b2_ref[...]
    o_ref[...] = out.astype(o_ref.dtype)


def norm_ffn(h, mean, rstd, gamma, beta, w1, b1, w2, b2, max_rows_per_tile=256):
    M, D = h.shape
    Dff = w1.shape[1]
    tm = _row_tile(M, max_rows_per_tile)
    const = lambda t: (0, 0)
    return pl.pallas_call(
        _norm_ffn_kernel,
        out_shape=jax.ShapeDtypeStruct((M, D), h.dtype),
        grid_spec=pltpu.PrefetchScalarGridSpec(
            num_scalar_prefetch=0,
            grid=(M // tm,),
            in_specs=[
                pl.BlockSpec((tm, D), lambda t: (t, 0)),
                pl.BlockSpec((1, D), const),
                pl.BlockSpec((1, D), const),
                pl.BlockSpec((1, D), const),
                pl.BlockSpec((1, D), const),
                pl.BlockSpec((D, Dff), const),
                pl.BlockSpec((1, Dff), const),
                pl.BlockSpec((Dff, D), const),
                pl.BlockSpec((1, D), const),
            ],
            out_specs=pl.BlockSpec((tm, D), lambda t: (t, 0)),
        ),
        compiler_params=pltpu.CompilerParams(
            dimension_semantics=("parallel",)),
    )(h, mean, rstd, gamma, beta, w1, b1, w2, b2)


# ----------------------------------------------------------------------------
# Kernel E: normalize only (norm2)
# ----------------------------------------------------------------------------
def _bn_apply_kernel(h_ref, mean_ref, rstd_ref, g_ref, be_ref, o_ref):
    x = h_ref[...].astype(jnp.float32)
    y = (x - mean_ref[...]) * rstd_ref[...] * g_ref[...] + be_ref[...]
    o_ref[...] = y.astype(o_ref.dtype)


def bn_apply(h, mean, rstd, gamma, beta, max_rows_per_tile=512):
    M, D = h.shape
    tm = _row_tile(M, max_rows_per_tile)
    const = lambda t: (0, 0)
    return pl.pallas_call(
        _bn_apply_kernel,
        out_shape=jax.ShapeDtypeStruct((M, D), h.dtype),
        grid_spec=pltpu.PrefetchScalarGridSpec(
            num_scalar_prefetch=0,
            grid=(M // tm,),
            in_specs=[
                pl.BlockSpec((tm, D), lambda t: (t, 0)),
                pl.BlockSpec((1, D), const),
                pl.BlockSpec((1, D), const),
                pl.BlockSpec((1, D), const),
                pl.BlockSpec((1, D), const),
            ],
            out_specs=pl.BlockSpec((tm, D), lambda t: (t, 0)),
        ),
        compiler_params=pltpu.CompilerParams(
            dimension_semantics=("parallel",)),
    )(h, mean, rstd, gamma, beta)


# ----------------------------------------------------------------------------
# Full encoder layer
# ----------------------------------------------------------------------------
def mha_encoder_layer(x, params, n_heads, eps=1e-5):
    """x: (B, N, D).  Weights use (in, out) convention, biases are (1, dim)."""
    B, N, D = x.shape
    h1 = attention_block(x, params["wq"], params["wk"], params["wv"],
                         params["wo"], params["bo"], n_heads)
    h1f = h1.reshape(B * N, D)                       # lane-dense flat layout
    mean1, rstd1 = bn_stats(h1f, eps)
    h2f = norm_ffn(h1f, mean1, rstd1, params["g1"], params["be1"],
                   params["w1"], params["b1"], params["w2"], params["b2"])
    mean2, rstd2 = bn_stats(h2f, eps)
    outf = bn_apply(h2f, mean2, rstd2, params["g2"], params["be2"])
    return outf.reshape(B, N, D)


# ----------------------------------------------------------------------------
# Pure-JAX reference (mirrors the PyTorch forward) + test
# ----------------------------------------------------------------------------
def _reference(x, p, n_heads, eps=1e-5):
    B, N, D = x.shape
    dh = D // n_heads
    q, k, v = x @ p["wq"], x @ p["wk"], x @ p["wv"]

    def heads(t):
        return t.reshape(B, N, n_heads, dh).transpose(0, 2, 1, 3)

    qh, kh, vh = heads(q), heads(k), heads(v)
    s = jnp.einsum("bhnd,bhmd->bhnm", qh, kh) / math.sqrt(dh)
    a = jnp.einsum("bhnm,bhmd->bhnd", jax.nn.softmax(s, axis=-1), vh)
    a = a.transpose(0, 2, 1, 3).reshape(B, N, D)
    h1 = x + (a @ p["wo"] + p["bo"])

    def bn(t, g, be):
        tf = t.reshape(-1, D)
        mu = tf.mean(axis=0)
        var = tf.var(axis=0)
        return ((tf - mu) * jax.lax.rsqrt(var + eps) * g + be).reshape(B, N, D)

    y = bn(h1, p["g1"], p["be1"])
    ff = jnp.maximum(y.reshape(-1, D) @ p["w1"] + p["b1"], 0.0) @ p["w2"] + p["b2"]
    h2 = y + ff.reshape(B, N, D)
    return bn(h2, p["g2"], p["be2"])


if __name__ == "__main__":
    B, N, D, H = 2, 8, 32, 8
    key = jax.random.PRNGKey(0)
    keys = jax.random.split(key, 13)
    std = 1.0 / math.sqrt(D)
    params = {
        "wq": jax.random.normal(keys[0], (D, D), jnp.float32) * std,
        "wk": jax.random.normal(keys[1], (D, D), jnp.float32) * std,
        "wv": jax.random.normal(keys[2], (D, D), jnp.float32) * std,
        "wo": jax.random.normal(keys[3], (D, D), jnp.float32) * std,
        "bo": jax.random.normal(keys[4], (1, D), jnp.float32) * 0.1,
        "w1": jax.random.normal(keys[5], (D, 4 * D), jnp.float32) * std,
        "b1": jax.random.normal(keys[6], (1, 4 * D), jnp.float32) * 0.1,
        "w2": jax.random.normal(keys[7], (4 * D, D), jnp.float32)
              * (1.0 / math.sqrt(4 * D)),
        "b2": jax.random.normal(keys[8], (1, D), jnp.float32) * 0.1,
        "g1": 1.0 + 0.1 * jax.random.normal(keys[9], (1, D), jnp.float32),
        "be1": 0.1 * jax.random.normal(keys[10], (1, D), jnp.float32),
        "g2": 1.0 + 0.1 * jax.random.normal(keys[11], (1, D), jnp.float32),
        "be2": 0.1 * jax.random.normal(keys[12], (1, D), jnp.float32),
    }
    x = jax.random.normal(jax.random.PRNGKey(42), (B, N, D), jnp.float32)

    out = mha_encoder_layer(x, params, H)
    out = jax.block_until_ready(out)

    ref = _reference(x, params, H)
    assert out.shape == (B, N, D)
    err = float(jnp.max(jnp.abs(out - ref)))
    assert jnp.allclose(out, ref, atol=1e-3, rtol=1e-3), f"mismatch, max err={err}"

    print("KERNEL_OK")
</pallas_src>

<mosaic_0001>
module attributes {stable_mosaic.version = 11 : i64} {
  func.func @kernel(%arg0: i32, %arg1: memref<1x8x32xf32, #tpu.memory_space<vmem>>, %arg2: memref<32x32xf32, #tpu.memory_space<vmem>>, %arg3: memref<32x32xf32, #tpu.memory_space<vmem>>, %arg4: memref<32x32xf32, #tpu.memory_space<vmem>>, %arg5: memref<32x32xf32, #tpu.memory_space<vmem>>, %arg6: memref<1x32xf32, #tpu.memory_space<vmem>>, %arg7: memref<1x8x32xf32, #tpu.memory_space<vmem>>) attributes {dimension_semantics = [#tpu.dimension_semantics<parallel>], iteration_bounds = array<i64: 2>, scalar_prefetch = 0 : i64, scratch_operands = 0 : i64, tpu.core_type = #tpu.core_type<tc>, window_params = [{transform_indices = @transform_0, window_bounds = array<i64: 1, 8, 32>}, {pipeline_mode = #tpu.pipeline_mode<synchronous>, transform_indices = @transform_1, window_bounds = array<i64: 32, 32>}, {pipeline_mode = #tpu.pipeline_mode<synchronous>, transform_indices = @transform_2, window_bounds = array<i64: 32, 32>}, {pipeline_mode = #tpu.pipeline_mode<synchronous>, transform_indices = @transform_3, window_bounds = array<i64: 32, 32>}, {pipeline_mode = #tpu.pipeline_mode<synchronous>, transform_indices = @transform_4, window_bounds = array<i64: 32, 32>}, {pipeline_mode = #tpu.pipeline_mode<synchronous>, transform_indices = @transform_5, window_bounds = array<i64: 1, 32>}, {transform_indices = @transform_6, window_bounds = array<i64: 1, 8, 32>}]} {
    %c0 = arith.constant 0 : index
    %c0_0 = arith.constant 0 : index
    %c0_1 = arith.constant 0 : index
    %0 = vector.load %arg1[%c0, %c0_0, %c0_1] : memref<1x8x32xf32, #tpu.memory_space<vmem>>, vector<1x8x32xf32>
    %1 = vector.shape_cast %0 : vector<1x8x32xf32> to vector<8x32xf32>
    %c0_2 = arith.constant 0 : index
    %c0_3 = arith.constant 0 : index
    %2 = vector.load %arg2[%c0_2, %c0_3] : memref<32x32xf32, #tpu.memory_space<vmem>>, vector<32x32xf32>
    %cst = arith.constant dense<0.000000e+00> : vector<8x32xf32>
    %3 = tpu.matmul %1, %2, %cst {dimension_numbers = #tpu.dot_dimension_numbers<[1], [0], [0], [1], [0, 0, 1, 1], [], []>} : vector<8x32xf32>, vector<32x32xf32>, vector<8x32xf32> -> vector<8x32xf32>
    %c0_4 = arith.constant 0 : index
    %c0_5 = arith.constant 0 : index
    %4 = vector.load %arg3[%c0_4, %c0_5] : memref<32x32xf32, #tpu.memory_space<vmem>>, vector<32x32xf32>
    %cst_6 = arith.constant dense<0.000000e+00> : vector<8x32xf32>
    %5 = tpu.matmul %1, %4, %cst_6 {dimension_numbers = #tpu.dot_dimension_numbers<[1], [0], [0], [1], [0, 0, 1, 1], [], []>} : vector<8x32xf32>, vector<32x32xf32>, vector<8x32xf32> -> vector<8x32xf32>
    %c0_7 = arith.constant 0 : index
    %c0_8 = arith.constant 0 : index
    %6 = vector.load %arg4[%c0_7, %c0_8] : memref<32x32xf32, #tpu.memory_space<vmem>>, vector<32x32xf32>
    %cst_9 = arith.constant dense<0.000000e+00> : vector<8x32xf32>
    %7 = tpu.matmul %1, %6, %cst_9 {dimension_numbers = #tpu.dot_dimension_numbers<[1], [0], [0], [1], [0, 0, 1, 1], [], []>} : vector<8x32xf32>, vector<32x32xf32>, vector<8x32xf32> -> vector<8x32xf32>
    %cst_10 = arith.constant 0.000000e+00 : f32
    %8 = vector.broadcast %cst_10 : f32 to vector<8x32xf32>
    %9 = vector.extract_strided_slice %3 {offsets = [0, 0], sizes = [8, 4], strides = [1, 1]} : vector<8x32xf32> to vector<8x4xf32>
    %10 = vector.extract_strided_slice %5 {offsets = [0, 0], sizes = [8, 4], strides = [1, 1]} : vector<8x32xf32> to vector<8x4xf32>
    %11 = vector.extract_strided_slice %7 {offsets = [0, 0], sizes = [8, 4], strides = [1, 1]} : vector<8x32xf32> to vector<8x4xf32>
    %cst_11 = arith.constant dense<0.000000e+00> : vector<8x8xf32>
    %12 = tpu.matmul %9, %10, %cst_11 {dimension_numbers = #tpu.dot_dimension_numbers<[1], [1], [0], [0], [0, 0, 1, 0], [], []>} : vector<8x4xf32>, vector<8x4xf32>, vector<8x8xf32> -> vector<8x8xf32>
    %cst_12 = arith.constant 5.000000e-01 : f32
    %13 = vector.broadcast %cst_12 : f32 to vector<8x8xf32>
    %14 = arith.mulf %12, %13 : vector<8x8xf32>
    %cst_13 = arith.constant dense<0xFF800000> : vector<8xf32>
    %15 = vector.multi_reduction <maximumf>, %14, %cst_13 [1] : vector<8x8xf32> to vector<8xf32>
    %16 = vector.shape_cast %15 : vector<8xf32> to vector<8x1xf32>
    %17 = vector.broadcast %16 : vector<8x1xf32> to vector<8x8xf32>
    %18 = arith.subf %14, %17 : vector<8x8xf32>
    %19 = math.exp %18 : vector<8x8xf32>
    %cst_14 = arith.constant dense<0.000000e+00> : vector<8xf32>
    %20 = vector.multi_reduction <add>, %19, %cst_14 [1] : vector<8x8xf32> to vector<8xf32>
    %21 = vector.shape_cast %20 : vector<8xf32> to vector<8x1xf32>
    %22 = vector.broadcast %21 : vector<8x1xf32> to vector<8x8xf32>
    %23 = arith.divf %19, %22 : vector<8x8xf32>
    %cst_15 = arith.constant dense<0.000000e+00> : vector<8x4xf32>
    %24 = tpu.matmul %23, %11, %cst_15 {dimension_numbers = #tpu.dot_dimension_numbers<[1], [0], [0], [1], [0, 0, 1, 1], [], []>} : vector<8x8xf32>, vector<8x4xf32>, vector<8x4xf32> -> vector<8x4xf32>
    %c0_16 = arith.constant 0 : index
    %c0_17 = arith.constant 0 : index
    %25 = vector.load %arg5[%c0_16, %c0_17] : memref<32x32xf32, #tpu.memory_space<vmem>>, vector<4x32xf32>
    %cst_18 = arith.constant dense<0.000000e+00> : vector<8x32xf32>
    %26 = tpu.matmul %24, %25, %cst_18 {dimension_numbers = #tpu.dot_dimension_numbers<[1], [0], [0], [1], [0, 0, 1, 1], [], []>} : vector<8x4xf32>, vector<4x32xf32>, vector<8x32xf32> -> vector<8x32xf32>
    %27 = arith.addf %8, %26 : vector<8x32xf32>
    %28 = vector.extract_strided_slice %3 {offsets = [0, 4], sizes = [8, 4], strides = [1, 1]} : vector<8x32xf32> to vector<8x4xf32>
    %29 = vector.extract_strided_slice %5 {offsets = [0, 4], sizes = [8, 4], strides = [1, 1]} : vector<8x32xf32> to vector<8x4xf32>
    %30 = vector.extract_strided_slice %7 {offsets = [0, 4], sizes = [8, 4], strides = [1, 1]} : vector<8x32xf32> to vector<8x4xf32>
    %cst_19 = arith.constant dense<0.000000e+00> : vector<8x8xf32>
    %31 = tpu.matmul %28, %29, %cst_19 {dimension_numbers = #tpu.dot_dimension_numbers<[1], [1], [0], [0], [0, 0, 1, 0], [], []>} : vector<8x4xf32>, vector<8x4xf32>, vector<8x8xf32> -> vector<8x8xf32>
    %cst_20 = arith.constant 5.000000e-01 : f32
    %32 = vector.broadcast %cst_20 : f32 to vector<8x8xf32>
    %33 = arith.mulf %31, %32 : vector<8x8xf32>
    %cst_21 = arith.constant dense<0xFF800000> : vector<8xf32>
    %34 = vector.multi_reduction <maximumf>, %33, %cst_21 [1] : vector<8x8xf32> to vector<8xf32>
    %35 = vector.shape_cast %34 : vector<8xf32> to vector<8x1xf32>
    %36 = vector.broadcast %35 : vector<8x1xf32> to vector<8x8xf32>
    %37 = arith.subf %33, %36 : vector<8x8xf32>
    %38 = math.exp %37 : vector<8x8xf32>
    %cst_22 = arith.constant dense<0.000000e+00> : vector<8xf32>
    %39 = vector.multi_reduction <add>, %38, %cst_22 [1] : vector<8x8xf32> to vector<8xf32>
    %40 = vector.shape_cast %39 : vector<8xf32> to vector<8x1xf32>
    %41 = vector.broadcast %40 : vector<8x1xf32> to vector<8x8xf32>
    %42 = arith.divf %38, %41 : vector<8x8xf32>
    %cst_23 = arith.constant dense<0.000000e+00> : vector<8x4xf32>
    %43 = tpu.matmul %42, %30, %cst_23 {dimension_numbers = #tpu.dot_dimension_numbers<[1], [0], [0], [1], [0, 0, 1, 1], [], []>} : vector<8x8xf32>, vector<8x4xf32>, vector<8x4xf32> -> vector<8x4xf32>
    %c4 = arith.constant 4 : index
    %c0_24 = arith.constant 0 : index
    %44 = vector.load %arg5[%c4, %c0_24] : memref<32x32xf32, #tpu.memory_space<vmem>>, vector<4x32xf32>
    %cst_25 = arith.constant dense<0.000000e+00> : vector<8x32xf32>
    %45 = tpu.matmul %43, %44, %cst_25 {dimension_numbers = #tpu.dot_dimension_numbers<[1], [0], [0], [1], [0, 0, 1, 1], [], []>} : vector<8x4xf32>, vector<4x32xf32>, vector<8x32xf32> -> vector<8x32xf32>
    %46 = arith.addf %27, %45 : vector<8x32xf32>
    %47 = vector.extract_strided_slice %3 {offsets = [0, 8], sizes = [8, 4], strides = [1, 1]} : vector<8x32xf32> to vector<8x4xf32>
    %48 = vector.extract_strided_slice %5 {offsets = [0, 8], sizes = [8, 4], strides = [1, 1]} : vector<8x32xf32> to vector<8x4xf32>
    %49 = vector.extract_strided_slice %7 {offsets = [0, 8], sizes = [8, 4], strides = [1, 1]} : vector<8x32xf32> to vector<8x4xf32>
    %cst_26 = arith.constant dense<0.000000e+00> : vector<8x8xf32>
    %50 = tpu.matmul %47, %48, %cst_26 {dimension_numbers = #tpu.dot_dimension_numbers<[1], [1], [0], [0], [0, 0, 1, 0], [], []>} : vector<8x4xf32>, vector<8x4xf32>, vector<8x8xf32> -> vector<8x8xf32>
    %cst_27 = arith.constant 5.000000e-01 : f32
    %51 = vector.broadcast %cst_27 : f32 to vector<8x8xf32>
    %52 = arith.mulf %50, %51 : vector<8x8xf32>
    %cst_28 = arith.constant dense<0xFF800000> : vector<8xf32>
    %53 = vector.multi_reduction <maximumf>, %52, %cst_28 [1] : vector<8x8xf32> to vector<8xf32>
    %54 = vector.shape_cast %53 : vector<8xf32> to vector<8x1xf32>
    %55 = vector.broadcast %54 : vector<8x1xf32> to vector<8x8xf32>
    %56 = arith.subf %52, %55 : vector<8x8xf32>
    %57 = math.exp %56 : vector<8x8xf32>
    %cst_29 = arith.constant dense<0.000000e+00> : vector<8xf32>
    %58 = vector.multi_reduction <add>, %57, %cst_29 [1] : vector<8x8xf32> to vector<8xf32>
    %59 = vector.shape_cast %58 : vector<8xf32> to vector<8x1xf32>
    %60 = vector.broadcast %59 : vector<8x1xf32> to vector<8x8xf32>
    %61 = arith.divf %57, %60 : vector<8x8xf32>
    %cst_30 = arith.constant dense<0.000000e+00> : vector<8x4xf32>
    %62 = tpu.matmul %61, %49, %cst_30 {dimension_numbers = #tpu.dot_dimension_numbers<[1], [0], [0], [1], [0, 0, 1, 1], [], []>} : vector<8x8xf32>, vector<8x4xf32>, vector<8x4xf32> -> vector<8x4xf32>
    %c8 = arith.constant 8 : index
    %c0_31 = arith.constant 0 : index
    %63 = vector.load %arg5[%c8, %c0_31] : memref<32x32xf32, #tpu.memory_space<vmem>>, vector<4x32xf32>
    %cst_32 = arith.constant dense<0.000000e+00> : vector<8x32xf32>
    %64 = tpu.matmul %62, %63, %cst_32 {dimension_numbers = #tpu.dot_dimension_numbers<[1], [0], [0], [1], [0, 0, 1, 1], [], []>} : vector<8x4xf32>, vector<4x32xf32>, vector<8x32xf32> -> vector<8x32xf32>
    %65 = arith.addf %46, %64 : vector<8x32xf32>
    %66 = vector.extract_strided_slice %3 {offsets = [0, 12], sizes = [8, 4], strides = [1, 1]} : vector<8x32xf32> to vector<8x4xf32>
    %67 = vector.extract_strided_slice %5 {offsets = [0, 12], sizes = [8, 4], strides = [1, 1]} : vector<8x32xf32> to vector<8x4xf32>
    %68 = vector.extract_strided_slice %7 {offsets = [0, 12], sizes = [8, 4], strides = [1, 1]} : vector<8x32xf32> to vector<8x4xf32>
    %cst_33 = arith.constant dense<0.000000e+00> : vector<8x8xf32>
    %69 = tpu.matmul %66, %67, %cst_33 {dimension_numbers = #tpu.dot_dimension_numbers<[1], [1], [0], [0], [0, 0, 1, 0], [], []>} : vector<8x4xf32>, vector<8x4xf32>, vector<8x8xf32> -> vector<8x8xf32>
    %cst_34 = arith.constant 5.000000e-01 : f32
    %70 = vector.broadcast %cst_34 : f32 to vector<8x8xf32>
    %71 = arith.mulf %69, %70 : vector<8x8xf32>
    %cst_35 = arith.constant dense<0xFF800000> : vector<8xf32>
    %72 = vector.multi_reduction <maximumf>, %71, %cst_35 [1] : vector<8x8xf32> to vector<8xf32>
    %73 = vector.shape_cast %72 : vector<8xf32> to vector<8x1xf32>
    %74 = vector.broadcast %73 : vector<8x1xf32> to vector<8x8xf32>
    %75 = arith.subf %71, %74 : vector<8x8xf32>
    %76 = math.exp %75 : vector<8x8xf32>
    %cst_36 = arith.constant dense<0.000000e+00> : vector<8xf32>
    %77 = vector.multi_reduction <add>, %76, %cst_36 [1] : vector<8x8xf32> to vector<8xf32>
    %78 = vector.shape_cast %77 : vector<8xf32> to vector<8x1xf32>
    %79 = vector.broadcast %78 : vector<8x1xf32> to vector<8x8xf32>
    %80 = arith.divf %76, %79 : vector<8x8xf32>
    %cst_37 = arith.constant dense<0.000000e+00> : vector<8x4xf32>
    %81 = tpu.matmul %80, %68, %cst_37 {dimension_numbers = #tpu.dot_dimension_numbers<[1], [0], [0], [1], [0, 0, 1, 1], [], []>} : vector<8x8xf32>, vector<8x4xf32>, vector<8x4xf32> -> vector<8x4xf32>
    %c12 = arith.constant 12 : index
    %c0_38 = arith.constant 0 : index
    %82 = vector.load %arg5[%c12, %c0_38] : memref<32x32xf32, #tpu.memory_space<vmem>>, vector<4x32xf32>
    %cst_39 = arith.constant dense<0.000000e+00> : vector<8x32xf32>
    %83 = tpu.matmul %81, %82, %cst_39 {dimension_numbers = #tpu.dot_dimension_numbers<[1], [0], [0], [1], [0, 0, 1, 1], [], []>} : vector<8x4xf32>, vector<4x32xf32>, vector<8x32xf32> -> vector<8x32xf32>
    %84 = arith.addf %65, %83 : vector<8x32xf32>
    %85 = vector.extract_strided_slice %3 {offsets = [0, 16], sizes = [8, 4], strides = [1, 1]} : vector<8x32xf32> to vector<8x4xf32>
    %86 = vector.extract_strided_slice %5 {offsets = [0, 16], sizes = [8, 4], strides = [1, 1]} : vector<8x32xf32> to vector<8x4xf32>
    %87 = vector.extract_strided_slice %7 {offsets = [0, 16], sizes = [8, 4], strides = [1, 1]} : vector<8x32xf32> to vector<8x4xf32>
    %cst_40 = arith.constant dense<0.000000e+00> : vector<8x8xf32>
    %88 = tpu.matmul %85, %86, %cst_40 {dimension_numbers = #tpu.dot_dimension_numbers<[1], [1], [0], [0], [0, 0, 1, 0], [], []>} : vector<8x4xf32>, vector<8x4xf32>, vector<8x8xf32> -> vector<8x8xf32>
    %cst_41 = arith.constant 5.000000e-01 : f32
    %89 = vector.broadcast %cst_41 : f32 to vector<8x8xf32>
    %90 = arith.mulf %88, %89 : vector<8x8xf32>
    %cst_42 = arith.constant dense<0xFF800000> : vector<8xf32>
    %91 = vector.multi_reduction <maximumf>, %90, %cst_42 [1] : vector<8x8xf32> to vector<8xf32>
    %92 = vector.shape_cast %91 : vector<8xf32> to vector<8x1xf32>
    %93 = vector.broadcast %92 : vector<8x1xf32> to vector<8x8xf32>
    %94 = arith.subf %90, %93 : vector<8x8xf32>
    %95 = math.exp %94 : vector<8x8xf32>
    %cst_43 = arith.constant dense<0.000000e+00> : vector<8xf32>
    %96 = vector.multi_reduction <add>, %95, %cst_43 [1] : vector<8x8xf32> to vector<8xf32>
    %97 = vector.shape_cast %96 : vector<8xf32> to vector<8x1xf32>
    %98 = vector.broadcast %97 : vector<8x1xf32> to vector<8x8xf32>
    %99 = arith.divf %95, %98 : vector<8x8xf32>
    %cst_44 = arith.constant dense<0.000000e+00> : vector<8x4xf32>
    %100 = tpu.matmul %99, %87, %cst_44 {dimension_numbers = #tpu.dot_dimension_numbers<[1], [0], [0], [1], [0, 0, 1, 1], [], []>} : vector<8x8xf32>, vector<8x4xf32>, vector<8x4xf32> -> vector<8x4xf32>
    %c16 = arith.constant 16 : index
    %c0_45 = arith.constant 0 : index
    %101 = vector.load %arg5[%c16, %c0_45] : memref<32x32xf32, #tpu.memory_space<vmem>>, vector<4x32xf32>
    %cst_46 = arith.constant dense<0.000000e+00> : vector<8x32xf32>
    %102 = tpu.matmul %100, %101, %cst_46 {dimension_numbers = #tpu.dot_dimension_numbers<[1], [0], [0], [1], [0, 0, 1, 1], [], []>} : vector<8x4xf32>, vector<4x32xf32>, vector<8x32xf32> -> vector<8x32xf32>
    %103 = arith.addf %84, %102 : vector<8x32xf32>
    %104 = vector.extract_strided_slice %3 {offsets = [0, 20], sizes = [8, 4], strides = [1, 1]} : vector<8x32xf32> to vector<8x4xf32>
    %105 = vector.extract_strided_slice %5 {offsets = [0, 20], sizes = [8, 4], strides = [1, 1]} : vector<8x32xf32> to vector<8x4xf32>
    %106 = vector.extract_strided_slice %7 {offsets = [0, 20], sizes = [8, 4], strides = [1, 1]} : vector<8x32xf32> to vector<8x4xf32>
    %cst_47 = arith.constant dense<0.000000e+00> : vector<8x8xf32>
    %107 = tpu.matmul %104, %105, %cst_47 {dimension_numbers = #tpu.dot_dimension_numbers<[1], [1], [0], [0], [0, 0, 1, 0], [], []>} : vector<8x4xf32>, vector<8x4xf32>, vector<8x8xf32> -> vector<8x8xf32>
    %cst_48 = arith.constant 5.000000e-01 : f32
    %108 = vector.broadcast %cst_48 : f32 to vector<8x8xf32>
    %109 = arith.mulf %107, %108 : vector<8x8xf32>
    %cst_49 = arith.constant dense<0xFF800000> : vector<8xf32>
    %110 = vector.multi_reduction <maximumf>, %109, %cst_49 [1] : vector<8x8xf32> to vector<8xf32>
    %111 = vector.shape_cast %110 : vector<8xf32> to vector<8x1xf32>
    %112 = vector.broadcast %111 : vector<8x1xf32> to vector<8x8xf32>
    %113 = arith.subf %109, %112 : vector<8x8xf32>
    %114 = math.exp %113 : vector<8x8xf32>
    %cst_50 = arith.constant dense<0.000000e+00> : vector<8xf32>
    %115 = vector.multi_reduction <add>, %114, %cst_50 [1] : vector<8x8xf32> to vector<8xf32>
    %116 = vector.shape_cast %115 : vector<8xf32> to vector<8x1xf32>
    %117 = vector.broadcast %116 : vector<8x1xf32> to vector<8x8xf32>
    %118 = arith.divf %114, %117 : vector<8x8xf32>
    %cst_51 = arith.constant dense<0.000000e+00> : vector<8x4xf32>
    %119 = tpu.matmul %118, %106, %cst_51 {dimension_numbers = #tpu.dot_dimension_numbers<[1], [0], [0], [1], [0, 0, 1, 1], [], []>} : vector<8x8xf32>, vector<8x4xf32>, vector<8x4xf32> -> vector<8x4xf32>
    %c20 = arith.constant 20 : index
    %c0_52 = arith.constant 0 : index
    %120 = vector.load %arg5[%c20, %c0_52] : memref<32x32xf32, #tpu.memory_space<vmem>>, vector<4x32xf32>
    %cst_53 = arith.constant dense<0.000000e+00> : vector<8x32xf32>
    %121 = tpu.matmul %119, %120, %cst_53 {dimension_numbers = #tpu.dot_dimension_numbers<[1], [0], [0], [1], [0, 0, 1, 1], [], []>} : vector<8x4xf32>, vector<4x32xf32>, vector<8x32xf32> -> vector<8x32xf32>
    %122 = arith.addf %103, %121 : vector<8x32xf32>
    %123 = vector.extract_strided_slice %3 {offsets = [0, 24], sizes = [8, 4], strides = [1, 1]} : vector<8x32xf32> to vector<8x4xf32>
    %124 = vector.extract_strided_slice %5 {offsets = [0, 24], sizes = [8, 4], strides = [1, 1]} : vector<8x32xf32> to vector<8x4xf32>
    %125 = vector.extract_strided_slice %7 {offsets = [0, 24], sizes = [8, 4], strides = [1, 1]} : vector<8x32xf32> to vector<8x4xf32>
    %cst_54 = arith.constant dense<0.000000e+00> : vector<8x8xf32>
    %126 = tpu.matmul %123, %124, %cst_54 {dimension_numbers = #tpu.dot_dimension_numbers<[1], [1], [0], [0], [0, 0, 1, 0], [], []>} : vector<8x4xf32>, vector<8x4xf32>, vector<8x8xf32> -> vector<8x8xf32>
    %cst_55 = arith.constant 5.000000e-01 : f32
    %127 = vector.broadcast %cst_55 : f32 to vector<8x8xf32>
    %128 = arith.mulf %126, %127 : vector<8x8xf32>
    %cst_56 = arith.constant dense<0xFF800000> : vector<8xf32>
    %129 = vector.multi_reduction <maximumf>, %128, %cst_56 [1] : vector<8x8xf32> to vector<8xf32>
    %130 = vector.shape_cast %129 : vector<8xf32> to vector<8x1xf32>
    %131 = vector.broadcast %130 : vector<8x1xf32> to vector<8x8xf32>
    %132 = arith.subf %128, %131 : vector<8x8xf32>
    %133 = math.exp %132 : vector<8x8xf32>
    %cst_57 = arith.constant dense<0.000000e+00> : vector<8xf32>
    %134 = vector.multi_reduction <add>, %133, %cst_57 [1] : vector<8x8xf32> to vector<8xf32>
    %135 = vector.shape_cast %134 : vector<8xf32> to vector<8x1xf32>
    %136 = vector.broadcast %135 : vector<8x1xf32> to vector<8x8xf32>
    %137 = arith.divf %133, %136 : vector<8x8xf32>
    %cst_58 = arith.constant dense<0.000000e+00> : vector<8x4xf32>
    %138 = tpu.matmul %137, %125, %cst_58 {dimension_numbers = #tpu.dot_dimension_numbers<[1], [0], [0], [1], [0, 0, 1, 1], [], []>} : vector<8x8xf32>, vector<8x4xf32>, vector<8x4xf32> -> vector<8x4xf32>
    %c24 = arith.constant 24 : index
    %c0_59 = arith.constant 0 : index
    %139 = vector.load %arg5[%c24, %c0_59] : memref<32x32xf32, #tpu.memory_space<vmem>>, vector<4x32xf32>
    %cst_60 = arith.constant dense<0.000000e+00> : vector<8x32xf32>
    %140 = tpu.matmul %138, %139, %cst_60 {dimension_numbers = #tpu.dot_dimension_numbers<[1], [0], [0], [1], [0, 0, 1, 1], [], []>} : vector<8x4xf32>, vector<4x32xf32>, vector<8x32xf32> -> vector<8x32xf32>
    %141 = arith.addf %122, %140 : vector<8x32xf32>
    %142 = vector.extract_strided_slice %3 {offsets = [0, 28], sizes = [8, 4], strides = [1, 1]} : vector<8x32xf32> to vector<8x4xf32>
    %143 = vector.extract_strided_slice %5 {offsets = [0, 28], sizes = [8, 4], strides = [1, 1]} : vector<8x32xf32> to vector<8x4xf32>
    %144 = vector.extract_strided_slice %7 {offsets = [0, 28], sizes = [8, 4], strides = [1, 1]} : vector<8x32xf32> to vector<8x4xf32>
    %cst_61 = arith.constant dense<0.000000e+00> : vector<8x8xf32>
    %145 = tpu.matmul %142, %143, %cst_61 {dimension_numbers = #tpu.dot_dimension_numbers<[1], [1], [0], [0], [0, 0, 1, 0], [], []>} : vector<8x4xf32>, vector<8x4xf32>, vector<8x8xf32> -> vector<8x8xf32>
    %cst_62 = arith.constant 5.000000e-01 : f32
    %146 = vector.broadcast %cst_62 : f32 to vector<8x8xf32>
    %147 = arith.mulf %145, %146 : vector<8x8xf32>
    %cst_63 = arith.constant dense<0xFF800000> : vector<8xf32>
    %148 = vector.multi_reduction <maximumf>, %147, %cst_63 [1] : vector<8x8xf32> to vector<8xf32>
    %149 = vector.shape_cast %148 : vector<8xf32> to vector<8x1xf32>
    %150 = vector.broadcast %149 : vector<8x1xf32> to vector<8x8xf32>
    %151 = arith.subf %147, %150 : vector<8x8xf32>
    %152 = math.exp %151 : vector<8x8xf32>
    %cst_64 = arith.constant dense<0.000000e+00> : vector<8xf32>
    %153 = vector.multi_reduction <add>, %152, %cst_64 [1] : vector<8x8xf32> to vector<8xf32>
    %154 = vector.shape_cast %153 : vector<8xf32> to vector<8x1xf32>
    %155 = vector.broadcast %154 : vector<8x1xf32> to vector<8x8xf32>
    %156 = arith.divf %152, %155 : vector<8x8xf32>
    %cst_65 = arith.constant dense<0.000000e+00> : vector<8x4xf32>
    %157 = tpu.matmul %156, %144, %cst_65 {dimension_numbers = #tpu.dot_dimension_numbers<[1], [0], [0], [1], [0, 0, 1, 1], [], []>} : vector<8x8xf32>, vector<8x4xf32>, vector<8x4xf32> -> vector<8x4xf32>
    %c28 = arith.constant 28 : index
    %c0_66 = arith.constant 0 : index
    %158 = vector.load %arg5[%c28, %c0_66] : memref<32x32xf32, #tpu.memory_space<vmem>>, vector<4x32xf32>
    %cst_67 = arith.constant dense<0.000000e+00> : vector<8x32xf32>
    %159 = tpu.matmul %157, %158, %cst_67 {dimension_numbers = #tpu.dot_dimension_numbers<[1], [0], [0], [1], [0, 0, 1, 1], [], []>} : vector<8x4xf32>, vector<4x32xf32>, vector<8x32xf32> -> vector<8x32xf32>
    %160 = arith.addf %141, %159 : vector<8x32xf32>
    %161 = arith.addf %1, %160 : vector<8x32xf32>
    %c0_68 = arith.constant 0 : index
    %c0_69 = arith.constant 0 : index
    %162 = vector.load %arg6[%c0_68, %c0_69] : memref<1x32xf32, #tpu.memory_space<vmem>>, vector<1x32xf32>
    %163 = vector.broadcast %162 : vector<1x32xf32> to vector<8x32xf32>
    %164 = arith.addf %161, %163 : vector<8x32xf32>
    %c0_70 = arith.constant 0 : index
    %c0_71 = arith.constant 0 : index
    %c0_72 = arith.constant 0 : index
    %165 = vector.load %arg7[%c0_70, %c0_71, %c0_72] : memref<1x8x32xf32, #tpu.memory_space<vmem>>, vector<1x8x32xf32>
    %166 = vector.shape_cast %165 : vector<1x8x32xf32> to vector<8x32xf32>
    %167 = vector.shape_cast %164 : vector<8x32xf32> to vector<1x8x32xf32>
    tpu.vector_store %arg7[%c0_70, %c0_71, %c0_72], %167 {strides = array<i32>} : memref<1x8x32xf32, #tpu.memory_space<vmem>>, vector<1x8x32xf32>,
    return
  }
  func.func @transform_0(%arg0: i32) -> (i32, i32, i32) {
    %c0_i32 = arith.constant 0 : i32
    %c0_i32_0 = arith.constant 0 : i32
    %c0_i32_1 = arith.constant 0 : i32
    return %arg0, %c0_i32, %c0_i32_0 : i32, i32, i32
  }
  func.func @transform_1(%arg0: i32) -> (i32, i32) {
    %c0_i32 = arith.constant 0 : i32
    %c0_i32_0 = arith.constant 0 : i32
    %c0_i32_1 = arith.constant 0 : i32
    return %c0_i32, %c0_i32_0 : i32, i32
  }
  func.func @transform_2(%arg0: i32) -> (i32, i32) {
    %c0_i32 = arith.constant 0 : i32
    %c0_i32_0 = arith.constant 0 : i32
    %c0_i32_1 = arith.constant 0 : i32
    return %c0_i32, %c0_i32_0 : i32, i32
  }
  func.func @transform_3(%arg0: i32) -> (i32, i32) {
    %c0_i32 = arith.constant 0 : i32
    %c0_i32_0 = arith.constant 0 : i32
    %c0_i32_1 = arith.constant 0 : i32
    return %c0_i32, %c0_i32_0 : i32, i32
  }
  func.func @transform_4(%arg0: i32) -> (i32, i32) {
    %c0_i32 = arith.constant 0 : i32
    %c0_i32_0 = arith.constant 0 : i32
    %c0_i32_1 = arith.constant 0 : i32
    return %c0_i32, %c0_i32_0 : i32, i32
  }
  func.func @transform_5(%arg0: i32) -> (i32, i32) {
    %c0_i32 = arith.constant 0 : i32
    %c0_i32_0 = arith.constant 0 : i32
    %c0_i32_1 = arith.constant 0 : i32
    return %c0_i32, %c0_i32_0 : i32, i32
  }
  func.func @transform_6(%arg0: i32) -> (i32, i32, i32) {
    %c0_i32 = arith.constant 0 : i32
    %c0_i32_0 = arith.constant 0 : i32
    %c0_i32_1 = arith.constant 0 : i32
    return %arg0, %c0_i32, %c0_i32_0 : i32, i32, i32
  }
}

</mosaic_0001>

<bundles_post_ra>
// kernel: tpu_custom_call.1
= control target key start
LH: loop header
LB: loop body
LE: loop exit
PB: predicated region body
PF: predicated region fallthrough
CT: control target
= control target key end

     0   :  { %s2170_s0 = inlined_call_operand.hbm [shape: f32[2,8,32], index: 0, kind: input, shape index: {}]   ;;  %s2171_s1 = inlined_call_operand.hbm [shape: f32[32,32], index: 1, kind: input, shape index: {}]   ;;  %s2172_s2 = inlined_call_operand.hbm [shape: f32[32,32], index: 2, kind: input, shape index: {}]   ;;  %s2173_s3 = inlined_call_operand.hbm [shape: f32[32,32], index: 3, kind: input, shape index: {}]   ;;  %s2174_s4 = inlined_call_operand.hbm [shape: f32[32,32], index: 4, kind: input, shape index: {}]   ;;  %s2175_s5 = inlined_call_operand.vmem [shape: f32[1,32], index: 5, kind: input, shape index: {}]   ;;  %s2176_s6 = inlined_call_operand.hbm [shape: f32[2,8,32], index: 6, kind: output, shape index: {}]  }
   0x1   :  { %2177 = sst [smem:[#allocation16_spill]] %s2171_s1 }
   0x2   :  { %11 = vsyncpa [#allocation3], 0 }
   0x3   :  { %13 = vsyncpa [#allocation3 + $0x1], 0 }
   0x4   :  { %14 = vsyncpa [#allocation6], 0 }
   0x5   :  { %15 = vsyncpa [#allocation9], 0 }
   0x6   :  { %16 = vsyncpa [#allocation4], 0 }
   0x7   :  { %18 = vsyncpa [#allocation4 + $0x1], 0  ;;  %s1862_s21 = smov 0   ;;  %s1864_s22 = smov 0  }
   0x8   :  { %s1866_s23 = smov 0   ;;  %s1868_s24 = smov 0  }
   0x9 LB: > { %s2178_s1 = sld [smem:[#allocation16_spill]]  ;;  %s1886_s28 = sadd.s32 4294967295, %s1812_s24   ;;  %s1812_s24 = sphi %s1868_s24, %s2190_s24   ;;  %s1808_s23 = sphi %s1866_s23, %s2189_s23   ;;  %s1804_s22 = sphi %s1864_s22, %s2188_s22   ;;  %s1800_s21 = sphi %s1862_s21, %s2187_s21  }
   0xa   : > { %p1397_p0 = scmp.ge.s32.totalorder %s1812_s24, 1  ;;  %p45_p1 = scmp.eq.s32.totalorder %s1886_s28, 0 }
   0xb   : > { %p186_p2 = scmp.lt.s32.totalorder %s1812_s24, 3  ;;  %s1814_s30 = smov [#allocation5]  }
   0xc   : > { %s199_s7 = sshll.u32 %s1814_s30, 4  ;;  %s225_s10 = sshll.u32 %s2173_s3, 4  ;;  %s200_s7 = int_to_ptr.vmem [resolvable:$true] %s199_s7  ;;  %s226_s10 = int_to_ptr.hbm [resolvable:$true] %s225_s10 }
   0xd   : > { %p1891_p3 = pnand %p1397_p0, %p186_p2  ;;  %s211_s14 = sshll.u32 %s2172_s2, 4  ;;  %s212_s14 = int_to_ptr.hbm [resolvable:$true] %s211_s14 }
   0xe   : > { %s1815_s15 = smov [#allocation8]   ;;  %s1816_s17 = smov 128  }
   0xf   : > { %s197_s27 = sshll.u32 %s2178_s1, 4  ;;  %p1479_p4 = pneg %p1891_p3  ;;  %s198_s27 = int_to_ptr.hbm [resolvable:$true] %s197_s27 }
  0x10   : > { %s227_s16 = sshll.u32 %s1815_s15, 4  ;;  %s1817_s18 = smov 8   ;;  %s228_s16 = int_to_ptr.vmem [resolvable:$true] %s227_s16 }
  0x11   : > { %p1903_p6 = pnand %p1479_p4, %p45_p1  ;;  %s239_s25 = sshll.u32 %s2174_s4, 4  ;;  %s240_s25 = int_to_ptr.hbm [resolvable:$true] %s239_s25 }
  0x12   : > { %s1818_s26 = smov [#allocation7]   ;;  %s1396_s8 = sadd.s32 4294967294, %s1812_s24  }
  0x13   : > { %1482 = dma.hbm_to_vmem [thread:$0]  (!%p1903_p6), %s198_s27, 512, %s200_s7, [#allocation6], %s1816_s17, %s1816_s17, %s1817_s18  }
  0x14   : > { %1488 = dma.hbm_to_vmem [thread:$0]  (!%p1903_p6), %s226_s10, 512, %s228_s16, [#allocation9], %s1816_s17, %s1816_s17, %s1817_s18  }
  0x15   : > { %s213_s30 = sshll.u32 %s1818_s26, 4  ;;  %s1819_s27 = smov [#allocation10]   ;;  %s214_s30 = int_to_ptr.vmem [resolvable:$true] %s213_s30 }
  0x16   : > { %1485 = dma.hbm_to_vmem [thread:$0]  (!%p1903_p6), %s212_s14, 512, %s214_s30, [#allocation6], %s1816_s17, %s1816_s17, %s1817_s18  }
  0x17   : > { %s241_s7 = sshll.u32 %s1819_s27, 4  ;;  %s1923_s9 = sadd.s32 1, %s1812_s24   ;;  %s242_s7 = int_to_ptr.vmem [resolvable:$true] %s241_s7 }
  0x18   : > { %1491 = dma.hbm_to_vmem [thread:$0]  (!%p1903_p6), %s240_s25, 512, %s242_s7, [#allocation9], %s1816_s17, %s1816_s17, %s1817_s18  }
  0x19   : > { %s28_s10 = ssub.s32 %s1812_s24, %s1923_s9  ;;  %s31_s12 = sadd.s32 1, %s1808_s23 }
  0x1a   : > { %p29_p7 = scmp.eq.s32.totalorder %s28_s10, 0  ;;  %p38_p8 = scmp.ne.s32.totalorder %s1808_s23, %s1804_s22 }
  0x1b   : > { %p39_p9 = scmp.eq.s32.totalorder %s1812_s24, 0  ;;  %p44_p10 = scmp.ne.s32.totalorder %s1804_s22, %s1800_s21 }
  0x1c   : > { %s1934_s13 = scalar_select %p29_p7, %s1808_s23, %s31_s12  }
  0x1d   : > { %p1936_p11 = por %p39_p9, %p38_p8  ;;  %p1942_p12 = por %p45_p1, %p44_p10 }
  0x1e   : > { %p173_p13 = scmp.eq.s32.totalorder %s1886_s28, 1  ;;  %p179_p0 = scmp.eq.s32.totalorder %s1396_s8, 1 }
  0x1f   : > { %p1504_p2 = scmp.lt.s32.totalorder %s1812_s24, 2  ;;  %s258_s15 = sand.u32 1, %s1808_s23  }
  0x20   : > { %p1949_p4 = por %p173_p13, %p38_p8  ;;  %p1953_p6 = por %p179_p0, %p44_p10 }
  0x21   : > { %s1403_s18 = sshll.u32 %s258_s15, 3  ;;  %s1404_s19 = sshll.u32 %s1812_s24, 3 }
  0x22   : > { %s266_s26 = scalar_lea.hbm %s2170_s0, %s1404_s19  ;;  %s262_s30 = scalar_lea.vmem [#allocation2], %s1403_s18 }
  0x23   : > { %s270_s27 = sshll.u32 %s262_s30, 4  ;;  %s268_s7 = sshll.u32 %s266_s26, 4  ;;  %s271_s27 = int_to_ptr.vmem [resolvable:$true] %s270_s27  ;;  %s269_s7 = int_to_ptr.hbm [resolvable:$true] %s268_s7 }
  0x24   : > { %p1963_p7 = pnand %p1504_p2, %p1936_p11  ;;  %s259_s10 = scalar_lea.sflag [#allocation3], %s258_s15 }
  0x25   : > { %s1708_s12 = sshra.s32 %s269_s7, 4  ;;  %s1715_s20 = scalar_lea.hbm %s2170_s0, 16  ;;  %s1709_s12 = int_to_ptr.hbm [resolvable:$true] %s1708_s12 }
  0x26   : > { %s1710_s1 = scalar_lea.hbm %s1709_s12, 8  ;;  %p1712_p9 = pneg %p1963_p7 }
  0x27   : > { %p1711_p8 = scmp.ne.s32.totalorder %s1709_s12, %s1710_s1  ;;  %p1716_p11 = scmp.lt.s32.totalorder %s1709_s12, %s2170_s0 }
  0x28   : > { %p1717_p0 = scmp.lt.s32.totalorder %s1715_s20, %s1710_s1 }
  0x29   : > { %p1713_p10 = pnand %p1712_p9, %p1711_p8 }
  0x2a   : > { %p1718_p2 = por %p1717_p0, %p1716_p11 }
  0x2b   : > { %p1714_p13 = pneg %p1713_p10 }
  0x2d   : > { %p1719_p5 = pnand %p1718_p2, %p1714_p13 }
  0x2f   : > { %1722 = shalt.err (!%p1719_p5)
}
  0x30   : > { %1495 = dma.hbm_to_vmem [thread:$0]  (!%p1963_p7), %s269_s7, 128, %s271_s27, %s259_s10  }
  0x31   : > { %279 = sbr.rel (%p1891_p3) target bundleno = 2472 (0x9a8), region = 44  ;;  %s1980_s15 = sand.u32 (!%p1891_p3), 1, %s1804_s22  }
  0x32   : > { %s1406_s26 = sshll.u32 (!%p1891_p3), %s1980_s15, 3  ;;  %s282_s30 = scalar_lea.sflag (!%p1891_p3), [#allocation3], %s1980_s15 }
  0x33   : > { %s285_s1 = scalar_lea.vmem (!%p1891_p3), [#allocation2], %s1406_s26 }
  0x36   : > { %1783 = dma.done.wait (%p1942_p12), %s282_s30, 128  }
  0x37   : > { %1785 = vsyncadd (%p1942_p12), %s282_s30, 4294967168 }
  0x38   : > { %1787 = dma.done.wait (%p45_p1), [#allocation6], 1024  }
  0x39   : > { %1789 = vsyncadd (%p45_p1), [#allocation6], 4294966272 }
  0x3a   : > { %1791 = dma.done.wait (%p45_p1), [#allocation9], 1024  }
  0x3b   : > { %1793 = vsyncadd (%p45_p1), [#allocation9], 4294966272  ;;  %v367_v0 = vld [vmem:[#allocation7 + $0x18] sm:$0xff]  ;;  %v366_v1 = vld [vmem:[#allocation7 + $0x10] sm:$0xff]  ;;  %vm340_vm0 = vcmask 261120   ;;  %vm412_vm1 = vcmask 31744  }
  0x3c   : > { %v339_v2 = vld [vmem:[#allocation5 + $0x18] sm:$0xff]  ;;  %380 = vmatpush.msra.mxu1 %v367_v0  ;;  %v338_v3 = vld [vmem:[#allocation5 + $0x10] sm:$0xff]  ;;  %v365_v4 = vld [vmem:[#allocation7 + $0x8] sm:$0xff]  ;;  %s1820_s29 = smov 120   ;;  %s1821_s11 = smov 124   ;;  %vm440_vm2 = vcmask 64512  }
  0x3d   : > { %356 = vmatpush.msra.mxu0 %v339_v2  ;;  %v337_v5 = vld [vmem:[#allocation5 + $0x8] sm:$0xff]  ;;  %v364_v6 = vld [vmem:[#allocation7] sm:$0xff]  ;;  %v1998_v8 = vld [vmem:[%s285_s1] sm:$0xff]  ;;  %s1822_s27 = smov 116   ;;  %vm573_vm3 = vcmask 1043456   ;;  %s1823_s7 = smov 112  }
  0x3e   : > { %381 = vmatpush.msra.mxu1 %v366_v1  ;;  %v336_v7 = vld [vmem:[#allocation5] sm:$0xff]  ;;  %v391_v17 = vld [vmem:[#allocation8 + $0x18] sm:$0xff]  ;;  %v390_v18 = vld [vmem:[#allocation8 + $0x10] sm:$0xff]  ;;  %s1824_s8 = smov 108   ;;  %s1825_s10 = smov 100  }
  0x3f   : > { %357 = vmatpush.msra.mxu0 %v338_v3  ;;  %404 = vmatpush.msra.mxu2 %v391_v17  ;;  %v389_v19 = vld [vmem:[#allocation8 + $0x8] sm:$0xff]  ;;  %v388_v20 = vld [vmem:[#allocation8] sm:$0xff]  ;;  %s1826_s12 = smov 104   ;;  %s1456_s18 = sshll.u32 %s1886_s28, 3 }
  0x40   : > { %382 = vmatpush.msra.mxu1 %v365_v4  ;;  %v488_v30 = vld [vmem:[#allocation10] sm:$0xf]  ;;  %s1283_s25 = scalar_lea.hbm %s2176_s6, %s1456_s18  ;;  %s334_s1 = scalar_lea.vmem [#allocation11], %s1406_s26 }
  0x41   : > { %358 = vmatpush.msra.mxu0 %v337_v5  ;;  %405 = vmatpush.msra.mxu2 %v390_v18  ;;  %s1273_s28 = scalar_lea.sflag [#allocation4], %s1980_s15  ;;  %s1758_s26 = scalar_lea.hbm %s2176_s6, 16 }
  0x42   : > { %383 = vmatpush.msra.mxu1 %v364_v6 }
  0x43   : > { %359 = vmatpush.msra.mxu0 %v336_v7  ;;  %1413 = vmatmul.msk.f32.vlgmr.msra.gmra.mxu1 %vm340_vm0, %v1998_v8 }
  0x44   : > { %1412 = vmatmul.msk.f32.vlgmr.msra.gmra.mxu0 %vm340_vm0, %v1998_v8  ;;  %406 = vmatpush.msra.mxu2 %v389_v19 }
  0x46   : > { %407 = vmatpush.msra.mxu2 %v388_v20 }
  0x47   : > { %1414 = vmatmul.msk.f32.vlgmr.msra.gmra.mxu2 %vm340_vm0, %v1998_v8 }
  0xc0   : > { %v2004_v9 = vpop.f32.mrf.mxu1 }
  0xc1   : > { %625 = vrot.lane.b32.xlu2 %v2004_v9, %s1820_s29  ;;  %491 = vrot.lane.b32.xlu1 %v2004_v9, %s1821_s11  ;;  %v2012_v10 = vpop.f32.mrf.mxu0 }
  0xc2   : > { %1415 = vmatpush.xpose.msk.msra.mxu3 %vm412_vm1, %v2004_v9 }
  0xc5   : > { %1416 = vmatmul.msk.f32.vlgmr.msra.gmra.mxu3 %vm412_vm1, %v2012_v10 }
  0xc9   : > { %732 = vrot.lane.b32.xlu2 %v2004_v9, %s1822_s27  ;;  %489 = vrot.lane.b32.xlu1 %v2012_v10, %s1821_s11 }
  0xca   : > { %v2032_v31 = vpop.f32.mrf.mxu2 }
  0xcb   : > { %483 = vmatpush.msrb.mxu3 %v2032_v31 }
  0xcd   : > { %1423 = vmatpush.msk.msra.mxu3 %vm573_vm3, %v488_v30 }
  0xd1   : > { %730 = vrot.lane.b32.xlu1 %v2012_v10, %s1822_s27 }
 0x11b   : > { %v626_v12 = vpop.permute.xlu2 %625 }
 0x123   : > { %v733_v29 = vpop.permute.xlu2 %732 }
 0x133   : > { %v492_v11 = vpop.permute.xlu1 %491 }
 0x134   : > { %1418 = vmatpush.xpose.msk.msrb.mxu0 %vm412_vm1, %v492_v11 }
 0x138   : > { %1425 = vmatpush.xpose.msk.msra.mxu0 %vm412_vm1, %v626_v12 }
 0x13b   : > { %v490_v13 = vpop.permute.xlu1 %489 }
 0x13c   : > { %1419 = vmatmul.msk.f32.vlgmr.msrb.gmra.mxu0 %vm412_vm1, %v490_v13 }
 0x143   : > { %v731_v54 = vpop.permute.xlu1 %730 }
 0x148   : > { %v436_v14 = vpop.f32.mrf.mxu3 }
 0x149   : > { %v439_v15 = vmul.f32 0.5, %v436_v14 }
 0x14b   : > { %v441_v16 = vsel %vm440_vm2, %v439_v15, -inf }
 0x14c   : > { %442 = vmax.xlane.f32.xlu0 %v441_v16 }
 0x1b9   : > { %v514_v21 = vpop.f32.mrf.mxu0 }
 0x1ba   : > { %v517_v22 = vmul.f32 0.5, %v514_v21 }
 0x1bc   : > { %v518_v23 = vsel %vm440_vm2, %v517_v22, -inf }
 0x1bd   : > { %519 = vmax.xlane.f32.xlu2 %v518_v23 }
 0x1bf   : > { %v443_v24 = vpop.xlane.xlu0 %442 }
 0x1c0   : > { %v444_v25 = vsub.f32 %v439_v15, %v443_v24  ;;  %v702_v24 = vld [vmem:[#allocation10 + $0x8] sm:$0xf] }
 0x1c2   : > { %v445_v26 = vmul.f32 1.442695, %v444_v25 }
 0x1c4   : > { %1556 = vpow2.f32 %v445_v26 }
 0x1ca   : > { %v1557_v27 = vpop.eup %1556 }
 0x1cb   : > { %v447_v28 = vsel %vm440_vm2, %v1557_v27, 0.0 }
 0x1cc   : > { %448 = vadd.xlane.f32.xlu0 %v447_v28 }
 0x1e0   : > { %623 = vrot.lane.b32.xlu0 %v2012_v10, %s1820_s29 }
 0x230   : > { %v520_v32 = vpop.xlane.xlu2 %519 }
 0x231   : > { %v521_v33 = vsub.f32 %v517_v22, %v520_v32  ;;  %v569_v22 = vld [vmem:[#allocation10 + $0x4] sm:$0xf] }
 0x232   : > { %1421 = vmatpush.msk.msrb.mxu2 %vm573_vm3, %v569_v22 }
 0x233   : > { %v522_v34 = vmul.f32 1.442695, %v521_v33 }
 0x234   : > { %1428 = vmatpush.msk.msra.mxu2 %vm573_vm3, %v702_v24 }
 0x235   : > { %1558 = vpow2.f32 %v522_v34 }
 0x23b   : > { %v2036_v35 = vpop.eup %1558 }
 0x23c   : > { %v524_v36 = vsel %vm440_vm2, %v2036_v35, 0.0 }
 0x23d   : > { %525 = vadd.xlane.f32.xlu2 %v524_v36 }
 0x23f   : > { %v449_v37 = vpop.xlane.xlu0 %448 }
 0x240   : > { %1560 = vrcp.f32 %v449_v37  ;;  %v461_v41 = vand.u32 2147483648, %v449_v37  ;;  %v459_v43 = vand.u32 2147483647, %v449_v37  ;;  %vm455_vm5 = vweird.f32 %v449_v37 }
 0x242   : > { %v462_v45 = vor.u32 1.1754944e-38, %v461_v41  ;;  %vm460_vm7 = vcmp.eq.f32.partialorder %v459_v43, 8.507059e+37 }
 0x246   : > { %v1561_v38 = vpop.eup %1560 }
 0x247   : > { %v451_v39 = vmul.f32 %v1561_v38, %v449_v37  ;;  %vm456_vm4 = vweird.f32 %v1561_v38 }
 0x248   : > { %vm457_vm6 = vmor %vm455_vm5, %vm456_vm4 }
 0x249   : > { %v452_v40 = vsub.f32 1.0, %v451_v39 }
 0x24b   : > { %v453_v42 = vmul.f32 %v1561_v38, %v452_v40 }
 0x24d   : > { %v454_v44 = vadd.f32 %v1561_v38, %v453_v42 }
 0x24f   : > { %v458_v46 = vsel %vm457_vm6, %v1561_v38, %v454_v44 }
 0x250   : > { %v463_v47 = vsel %vm460_vm7, %v462_v45, %v458_v46 }
 0x251   : > { %v464_v48 = vmul.f32 %v1557_v27, %v463_v47 }
 0x252   : > { %v624_v49 = vpop.permute.xlu0 %623 }
 0x253   : > { %1417 = vmatmul.msk.f32.vlgmr.msrb.gmra.mxu3 %vm440_vm2, %v464_v48  ;;  %1426 = vmatmul.msk.f32.vlgmr.msra.gmra.mxu0 %vm412_vm1, %v624_v49 }
 0x254   : > { %1430 = vmatpush.xpose.msk.msrb.mxu3 %vm412_vm1, %v733_v29 }
 0x2b0   : > { %v526_v0 = vpop.xlane.xlu2 %525 }
 0x2b1   : > { %v538_v6 = vand.u32 2147483648, %v526_v0  ;;  %vm532_vm9 = vweird.f32 %v526_v0  ;;  %v536_v7 = vand.u32 2147483647, %v526_v0 }
 0x2b3   : > { %v539_v13 = vor.u32 1.1754944e-38, %v538_v6  ;;  %vm537_vm11 = vcmp.eq.f32.partialorder %v536_v7, 8.507059e+37 }
 0x2d0   : > { %v648_v50 = vpop.f32.mrf.mxu0 }
 0x2d1   : > { %v651_v51 = vmul.f32 0.5, %v648_v50 }
 0x2d3   : > { %v652_v52 = vsel %vm440_vm2, %v651_v51, -inf }
 0x2d4   : > { %653 = vmax.xlane.f32.xlu1 %v652_v52  ;;  %v809_v52 = vld [vmem:[#allocation10 + $0xc] sm:$0xf] }
 0x2d6   : > { %v485_v53 = vpop.f32.mrf.mxu3 }
 0x2d7   : > { %1424 = vmatmul.msk.f32.vlgmr.msra.gmra.mxu3 %vm412_vm1, %v485_v53 }
 0x2df   : > { %1431 = vmatmul.msk.f32.vlgmr.msrb.gmra.mxu3 %vm412_vm1, %v731_v54 }
 0x347   : > { %v654_v55 = vpop.xlane.xlu1 %653 }
 0x348   : > { %v655_v56 = vsub.f32 %v651_v51, %v654_v55 }
 0x34a   : > { %v656_v57 = vmul.f32 1.442695, %v655_v56 }
 0x34c   : > { %1562 = vpow2.f32 %v656_v57 }
 0x34d   : > { %1564 = vrcp.f32 %v526_v0 }
 0x352   : > { %v2046_v58 = vpop.eup %1562 }
 0x353   : > { %v658_v59 = vsel %vm440_vm2, %v2046_v58, 0.0  ;;  %v1565_v1 = vpop.eup %1564 }
 0x354   : > { %659 = vadd.xlane.f32.xlu2 %v658_v59  ;;  %v528_v2 = vmul.f32 %v1565_v1, %v526_v0  ;;  %vm533_vm8 = vweird.f32 %v1565_v1 }
 0x355   : > { %vm534_vm10 = vmor %vm532_vm9, %vm533_vm8 }
 0x356   : > { %v529_v3 = vsub.f32 1.0, %v528_v2 }
 0x358   : > { %v530_v4 = vmul.f32 %v1565_v1, %v529_v3 }
 0x35a   : > { %v2050_v60 = vpop.f32.mrf.mxu3  ;;  %v531_v5 = vadd.f32 %v1565_v1, %v530_v4 }
 0x35c   : > { %v535_v12 = vsel %vm534_vm10, %v1565_v1, %v531_v5 }
 0x35d   : > { %v540_v14 = vsel %vm537_vm11, %v539_v13, %v535_v12 }
 0x35e   : > { %v541_v16 = vmul.f32 %v2036_v35, %v540_v14 }
 0x362   : > { %v755_v61 = vpop.f32.mrf.mxu3 }
 0x363   : > { %v758_v62 = vmul.f32 0.5, %v755_v61 }
 0x365   : > { %v759_v63 = vsel %vm440_vm2, %v758_v62, -inf }
 0x366   : > { %760 = vmax.xlane.f32.xlu0 %v759_v63 }
 0x36c   : > { %543 = vrot.lane.b32.xlu2 %v2032_v31, %s1821_s11  ;;  %s1287_s11 = sshll.u32 %s1283_s25, 4  ;;  %s1288_s11 = int_to_ptr.hbm [resolvable:$true] %s1287_s11 }
 0x374   : > { %839 = vrot.lane.b32.xlu2 %v2004_v9, %s1823_s7 }
 0x37a   : > { %783 = vrot.lane.b32.xlu0 %v2032_v31, %s1822_s27  ;;  %s1752_s27 = sshra.s32 %s1288_s11, 4  ;;  %s1753_s27 = int_to_ptr.hbm [resolvable:$true] %s1752_s27 }
 0x37b   : > { %p1759_p12 = scmp.lt.s32.totalorder %s1753_s27, %s2176_s6 }
 0x37c   : > { %944 = vrot.lane.b32.xlu2 %v2012_v10, %s1824_s8 }
 0x382   : > { %837 = vrot.lane.b32.xlu0 %v2012_v10, %s1823_s7 }
 0x3c7   : > { %v660_v11 = vpop.xlane.xlu2 %659 }
 0x3c8   : > { %v672_v41 = vand.u32 2147483648, %v660_v11  ;;  %vm666_vm4 = vweird.f32 %v660_v11  ;;  %v670_v43 = vand.u32 2147483647, %v660_v11 }
 0x3ca   : > { %v673_v48 = vor.u32 1.1754944e-38, %v672_v41  ;;  %vm671_vm7 = vcmp.eq.f32.partialorder %v670_v43, 8.507059e+37 }
 0x3cf   : > { %v544_v15 = vpop.permute.xlu2 %543 }
 0x3d0   : > { %564 = vmatpush.msrb.mxu1 %v544_v15 }
 0x3d1   : > { %1420 = vmatmul.msk.f32.vlgmr.msrb.gmra.mxu1 %vm440_vm2, %v541_v16 }
 0x3d7   : > { %v840_v26 = vpop.permute.xlu2 %839 }
 0x3d9   : > { %v761_v17 = vpop.xlane.xlu0 %760 }
 0x3da   : > { %v762_v18 = vsub.f32 %v758_v62, %v761_v17 }
 0x3dc   : > { %v763_v19 = vmul.f32 1.442695, %v762_v18 }
 0x3de   : > { %1566 = vpow2.f32 %v763_v19 }
 0x3df   : > { %1568 = vrcp.f32 %v660_v11  ;;  %v945_v56 = vpop.permute.xlu2 %944 }
 0x3e4   : > { %v1567_v20 = vpop.eup %1566 }
 0x3e5   : > { %v765_v21 = vsel %vm440_vm2, %v1567_v20, 0.0  ;;  %v1569_v27 = vpop.eup %1568 }
 0x3e6   : > { %766 = vadd.xlane.f32.xlu1 %v765_v21  ;;  %v662_v29 = vmul.f32 %v1569_v27, %v660_v11  ;;  %vm667_vm13 = vweird.f32 %v1569_v27  ;;  %v1023_v21 = vld [vmem:[#allocation10 + $0x14] sm:$0xf] }
 0x3e7   : > { %vm668_vm6 = vmor %vm666_vm4, %vm667_vm13 }
 0x3e8   : > { %v663_v30 = vsub.f32 1.0, %v662_v29 }
 0x3ea   : > { %v664_v34 = vmul.f32 %v1569_v27, %v663_v30 }
 0x3ec   : > { %v784_v23 = vpop.permute.xlu0 %783  ;;  %v665_v39 = vadd.f32 %v1569_v27, %v664_v34 }
 0x3ed   : > { %804 = vmatpush.msrb.mxu0 %v784_v23 }
 0x3ee   : > { %v669_v46 = vsel %vm668_vm6, %v1569_v27, %v665_v39 }
 0x3ef   : > { %v674_v49 = vsel %vm671_vm7, %v673_v48, %v669_v46 }
 0x3f0   : > { %v675_v51 = vmul.f32 %v2046_v58, %v674_v49 }
 0x3f4   : > { %v838_v57 = vpop.permute.xlu0 %837 }
 0x3ff   : > { %676 = vrot.lane.b32.xlu1 %v2032_v31, %s1820_s29  ;;  %s1285_s29 = sshll.u32 %s334_s1, 4  ;;  %s1286_s29 = int_to_ptr.vmem [resolvable:$true] %s1285_s29 }
 0x407   : > { %946 = vrot.lane.b32.xlu1 %v2004_v9, %s1824_s8 }
 0x44e   : > { %v566_v25 = vpop.f32.mrf.mxu1 }
 0x44f   : > { %1422 = vmatmul.msk.f32.vlgmr.msrb.gmra.mxu2 %vm412_vm1, %v566_v25 }
 0x450   : > { %1435 = vmatpush.xpose.msk.msrb.mxu2 %vm412_vm1, %v840_v26 }
 0x459   : > { %v767_v28 = vpop.xlane.xlu1 %766 }
 0x45a   : > { %1570 = vrcp.f32 %v767_v28  ;;  %v779_v36 = vand.u32 2147483648, %v767_v28  ;;  %v777_v38 = vand.u32 2147483647, %v767_v28  ;;  %vm773_vm14 = vweird.f32 %v767_v28 }
 0x45c   : > { %v780_v42 = vor.u32 1.1754944e-38, %v779_v36  ;;  %vm778_vm5 = vcmp.eq.f32.partialorder %v777_v38, 8.507059e+37 }
 0x460   : > { %v1571_v32 = vpop.eup %1570 }
 0x461   : > { %v769_v33 = vmul.f32 %v1571_v32, %v767_v28  ;;  %vm774_vm12 = vweird.f32 %v1571_v32 }
 0x462   : > { %vm775_vm15 = vmor %vm773_vm14, %vm774_vm12 }
 0x463   : > { %v770_v35 = vsub.f32 1.0, %v769_v33 }
 0x465   : > { %v771_v37 = vmul.f32 %v1571_v32, %v770_v35 }
 0x467   : > { %v772_v40 = vadd.f32 %v1571_v32, %v771_v37 }
 0x469   : > { %v776_v44 = vsel %vm775_vm15, %v1571_v32, %v772_v40 }
 0x46a   : > { %v781_v45 = vsel %vm778_vm5, %v780_v42, %v776_v44 }
 0x46b   : > { %v782_v47 = vmul.f32 %v1567_v20, %v781_v45  ;;  %v916_v20 = vld [vmem:[#allocation10 + $0x10] sm:$0xf] }
 0x46c   : > { %1438 = vmatpush.msk.msra.mxu0 %vm573_vm3, %v916_v20 }
 0x46d   : > { %1432 = vmatmul.msk.f32.vlgmr.msrb.gmra.mxu0 %vm440_vm2, %v782_v47 }
 0x471   : > { %v677_v50 = vpop.permute.xlu1 %676 }
 0x472   : > { %697 = vmatpush.msra.mxu1 %v677_v50 }
 0x473   : > { %1427 = vmatmul.msk.f32.vlgmr.msra.gmra.mxu1 %vm440_vm2, %v675_v51 }
 0x474   : > { %1433 = vmatpush.msk.msrb.mxu1 %vm573_vm3, %v809_v52 }
 0x479   : > { %v947_v53 = vpop.permute.xlu1 %946 }
 0x47a   : > { %1440 = vmatpush.xpose.msk.msra.mxu1 %vm412_vm1, %v947_v53 }
 0x4d2   : > { %v594_v59 = vpop.f32.mrf.mxu2 }
 0x4d3   : > { %v621_v63 = vadd.f32 %v2050_v60, %v594_v59 }
 0x4ea   : > { %v806_v54 = vpop.f32.mrf.mxu0 }
 0x4eb   : > { %1434 = vmatmul.msk.f32.vlgmr.msrb.gmra.mxu1 %vm412_vm1, %v806_v54 }
 0x4f0   : > { %v699_v55 = vpop.f32.mrf.mxu1 }
 0x4f1   : > { %1429 = vmatmul.msk.f32.vlgmr.msra.gmra.mxu2 %vm412_vm1, %v699_v55 }
 0x4f3   : > { %1441 = vmatmul.msk.f32.vlgmr.msra.gmra.mxu1 %vm412_vm1, %v945_v56 }
 0x4f9   : > { %1436 = vmatmul.msk.f32.vlgmr.msrb.gmra.mxu2 %vm412_vm1, %v838_v57 }
 0x568   : > { %v833_v58 = vpop.f32.mrf.mxu1 }
 0x570   : > { %v969_v61 = vpop.f32.mrf.mxu1 }
 0x571   : > { %v972_v62 = vmul.f32 0.5, %v969_v61 }
 0x573   : > { %v973_v0 = vsel %vm440_vm2, %v972_v62, -inf }
 0x574   : > { %v726_v1 = vpop.f32.mrf.mxu2  ;;  %974 = vmax.xlane.f32.xlu1 %v973_v0 }
 0x575   : > { %v729_v2 = vadd.f32 %v726_v1, %v621_v63 }
 0x577   : > { %v2085_v3 = vadd.f32 %v833_v58, %v729_v2 }
 0x57c   : > { %v862_v4 = vpop.f32.mrf.mxu2 }
 0x57d   : > { %v865_v5 = vmul.f32 0.5, %v862_v4 }
 0x57f   : > { %v866_v6 = vsel %vm440_vm2, %v865_v5, -inf }
 0x580   : > { %867 = vmax.xlane.f32.xlu0 %v866_v6 }
 0x58d   : > { %890 = vrot.lane.b32.xlu1 %v2032_v31, %s1823_s7  ;;  %s1754_s7 = scalar_lea.hbm %s1753_s27, 8 }
 0x58e   : > { %p1755_p1 = scmp.ne.s32.totalorder %s1753_s27, %s1754_s7  ;;  %p1760_p7 = scmp.lt.s32.totalorder %s1758_s26, %s1754_s7 }
 0x590   : > { %p1756_p3 = pnand %p1755_p1, %p1949_p4  ;;  %p1761_p8 = por %p1760_p7, %p1759_p12 }
 0x592   : > { %p1757_p5 = pneg %p1756_p3 }
 0x594   : > { %p1762_p9 = pnand %p1761_p8, %p1757_p5 }
 0x595   : > { %1160 = vrot.lane.b32.xlu1 %v2004_v9, %s1825_s10 }
 0x5e7   : > { %v975_v60 = vpop.xlane.xlu1 %974 }
 0x5e8   : > { %v976_v7 = vsub.f32 %v972_v62, %v975_v60 }
 0x5ea   : > { %v977_v11 = vmul.f32 1.442695, %v976_v7 }
 0x5ec   : > { %1572 = vpow2.f32 %v977_v11 }
 0x5f2   : > { %v1573_v12 = vpop.eup %1572 }
 0x5f3   : > { %v868_v13 = vpop.xlane.xlu0 %867  ;;  %v979_v14 = vsel %vm440_vm2, %v1573_v12, 0.0 }
 0x5f4   : > { %v869_v15 = vsub.f32 %v865_v5, %v868_v13  ;;  %980 = vadd.xlane.f32.xlu0 %v979_v14 }
 0x5f6   : > { %v870_v16 = vmul.f32 1.442695, %v869_v15 }
 0x5f8   : > { %1574 = vpow2.f32 %v870_v16 }
 0x5fe   : > { %v1575_v17 = vpop.eup %1574 }
 0x5ff   : > { %v891_v18 = vpop.permute.xlu1 %890  ;;  %v872_v19 = vsel %vm440_vm2, %v1575_v17, 0.0 }
 0x600   : > { %911 = vmatpush.msra.mxu3 %v891_v18  ;;  %873 = vadd.xlane.f32.xlu2 %v872_v19 }
 0x602   : > { %1443 = vmatpush.msk.msrb.mxu3 %vm573_vm3, %v1023_v21 }
 0x607   : > { %v1161_v47 = vpop.permute.xlu1 %1160 }
 0x608   : > { %1053 = vrot.lane.b32.xlu0 %v2004_v9, %s1826_s12 }
 0x610   : > { %1051 = vrot.lane.b32.xlu0 %v2012_v10, %s1826_s12 }
 0x618   : > { %997 = vrot.lane.b32.xlu2 %v2032_v31, %s1824_s8 }
 0x620   : > { %1158 = vrot.lane.b32.xlu2 %v2012_v10, %s1825_s10 }
 0x667   : > { %v981_v22 = vpop.xlane.xlu0 %980 }
 0x668   : > { %1576 = vrcp.f32 %v981_v22  ;;  %v993_v25 = vand.u32 2147483648, %v981_v22  ;;  %v991_v27 = vand.u32 2147483647, %v981_v22  ;;  %vm987_vm9 = vweird.f32 %v981_v22 }
 0x66a   : > { %v994_v10 = vor.u32 1.1754944e-38, %v993_v25  ;;  %vm992_vm11 = vcmp.eq.f32.partialorder %v991_v27, 8.507059e+37 }
 0x66e   : > { %v1577_v23 = vpop.eup %1576 }
 0x66f   : > { %v983_v24 = vmul.f32 %v1577_v23, %v981_v22  ;;  %vm988_vm8 = vweird.f32 %v1577_v23 }
 0x670   : > { %vm989_vm10 = vmor %vm987_vm9, %vm988_vm8 }
 0x671   : > { %v984_v9 = vsub.f32 1.0, %v983_v24 }
 0x673   : > { %v985_v26 = vmul.f32 %v1577_v23, %v984_v9  ;;  %v874_v28 = vpop.xlane.xlu2 %873 }
 0x674   : > { %1578 = vrcp.f32 %v874_v28  ;;  %v886_v39 = vand.u32 2147483648, %v874_v28  ;;  %v884_v41 = vand.u32 2147483647, %v874_v28  ;;  %vm880_vm13 = vweird.f32 %v874_v28 }
 0x675   : > { %v986_v29 = vadd.f32 %v1577_v23, %v985_v26 }
 0x676   : > { %v887_v43 = vor.u32 1.1754944e-38, %v886_v39  ;;  %vm885_vm15 = vcmp.eq.f32.partialorder %v884_v41, 8.507059e+37 }
 0x677   : > { %v990_v30 = vsel %vm989_vm10, %v1577_v23, %v986_v29 }
 0x678   : > { %v995_v32 = vsel %vm992_vm11, %v994_v10, %v990_v30 }
 0x679   : > { %v996_v37 = vmul.f32 %v1573_v12, %v995_v32 }
 0x67a   : > { %v1579_v33 = vpop.eup %1578  ;;  %v1054_v34 = vpop.permute.xlu0 %1053 }
 0x67b   : > { %v876_v35 = vmul.f32 %v1579_v33, %v874_v28  ;;  %v998_v36 = vpop.permute.xlu2 %997  ;;  %1445 = vmatpush.xpose.msk.msrb.mxu0 %vm412_vm1, %v1054_v34  ;;  %vm881_vm12 = vweird.f32 %v1579_v33 }
 0x67c   : > { %1018 = vmatpush.msra.mxu2 %v998_v36  ;;  %vm882_vm14 = vmor %vm880_vm13, %vm881_vm12  ;;  %v1130_v36 = vld [vmem:[#allocation10 + $0x18] sm:$0xf] }
 0x67d   : > { %v877_v38 = vsub.f32 1.0, %v876_v35  ;;  %1442 = vmatmul.msk.f32.vlgmr.msra.gmra.mxu2 %vm440_vm2, %v996_v37  ;;  %v1237_v35 = vld [vmem:[#allocation10 + $0x1c] sm:$0xf] }
 0x67e   : > { %1448 = vmatpush.msk.msrb.mxu2 %vm573_vm3, %v1130_v36 }
 0x67f   : > { %v878_v40 = vmul.f32 %v1579_v33, %v877_v38 }
 0x681   : > { %v879_v42 = vadd.f32 %v1579_v33, %v878_v40 }
 0x682   : > { %v1052_v51 = vpop.permute.xlu0 %1051 }
 0x683   : > { %v883_v44 = vsel %vm882_vm14, %v1579_v33, %v879_v42  ;;  %v1159_v49 = vpop.permute.xlu2 %1158 }
 0x684   : > { %v888_v45 = vsel %vm885_vm15, %v887_v43, %v883_v44  ;;  %v1555_v43 = vld [vmem:[%s2175_s5] ss:$0 sm:$0xff] }
 0x685   : > { %v889_v46 = vmul.f32 %v1575_v17, %v888_v45 }
 0x687   : > { %1437 = vmatmul.msk.f32.vlgmr.msra.gmra.mxu3 %vm440_vm2, %v889_v46 }
 0x688   : > { %1450 = vmatpush.xpose.msk.msra.mxu3 %vm412_vm1, %v1161_v47 }
 0x700   : > { %v1020_v48 = vpop.f32.mrf.mxu2 }
 0x701   : > { %1444 = vmatmul.msk.f32.vlgmr.msrb.gmra.mxu3 %vm412_vm1, %v1020_v48 }
 0x709   : > { %1451 = vmatmul.msk.f32.vlgmr.msra.gmra.mxu3 %vm412_vm1, %v1159_v49 }
 0x70a   : > { %v913_v50 = vpop.f32.mrf.mxu3 }
 0x70b   : > { %1439 = vmatmul.msk.f32.vlgmr.msra.gmra.mxu0 %vm412_vm1, %v913_v50 }
 0x713   : > { %1446 = vmatmul.msk.f32.vlgmr.msrb.gmra.mxu0 %vm412_vm1, %v1052_v51 }
 0x784   : > { %v1047_v52 = vpop.f32.mrf.mxu3 }
 0x788   : > { %v940_v53 = vpop.f32.mrf.mxu0 }
 0x789   : > { %v943_v54 = vadd.f32 %v940_v53, %v2085_v3 }
 0x78b   : > { %v2113_v55 = vadd.f32 %v1047_v52, %v943_v54 }
 0x78c   : > { %v1183_v56 = vpop.f32.mrf.mxu3 }
 0x78d   : > { %v1186_v57 = vmul.f32 0.5, %v1183_v56 }
 0x78f   : > { %v1187_v58 = vsel %vm440_vm2, %v1186_v57, -inf }
 0x790   : > { %1188 = vmax.xlane.f32.xlu0 %v1187_v58  ;;  %v1076_v59 = vpop.f32.mrf.mxu0 }
 0x791   : > { %v1079_v61 = vmul.f32 0.5, %v1076_v59 }
 0x793   : > { %v1080_v62 = vsel %vm440_vm2, %v1079_v61, -inf }
 0x794   : > { %1081 = vmax.xlane.f32.xlu1 %v1080_v62 }
 0x7a4   : > { %1104 = vrot.lane.b32.xlu0 %v2032_v31, %s1826_s12 }
 0x803   : > { %v1189_v63 = vpop.xlane.xlu0 %1188 }
 0x804   : > { %v1190_v0 = vsub.f32 %v1186_v57, %v1189_v63 }
 0x806   : > { %v1191_v1 = vmul.f32 1.442695, %v1190_v0 }
 0x807   : > { %v1082_v2 = vpop.xlane.xlu1 %1081 }
 0x808   : > { %1580 = vpow2.f32 %v1191_v1  ;;  %v1083_v3 = vsub.f32 %v1079_v61, %v1082_v2 }
 0x80a   : > { %v1084_v4 = vmul.f32 1.442695, %v1083_v3 }
 0x80c   : > { %1582 = vpow2.f32 %v1084_v4 }
 0x80e   : > { %v1581_v5 = vpop.eup %1580 }
 0x80f   : > { %v1193_v6 = vsel %vm440_vm2, %v1581_v5, 0.0 }
 0x810   : > { %1194 = vadd.xlane.f32.xlu1 %v1193_v6 }
 0x812   : > { %v1583_v60 = vpop.eup %1582 }
 0x813   : > { %v1086_v7 = vsel %vm440_vm2, %v1583_v60, 0.0 }
 0x814   : > { %1087 = vadd.xlane.f32.xlu2 %v1086_v7 }
 0x816   : > { %v1105_v11 = vpop.permute.xlu0 %1104 }
 0x817   : > { %1125 = vmatpush.msrb.mxu1 %v1105_v11 }
 0x819   : > { %1453 = vmatpush.msk.msra.mxu1 %vm573_vm3, %v1237_v35 }
 0x82c   : > { %1211 = vrot.lane.b32.xlu2 %v2032_v31, %s1825_s10 }
 0x883   : > { %v1195_v12 = vpop.xlane.xlu1 %1194 }
 0x884   : > { %1584 = vrcp.f32 %v1195_v12  ;;  %v1205_v18 = vand.u32 2147483647, %v1195_v12  ;;  %v1207_v19 = vand.u32 2147483648, %v1195_v12  ;;  %vm1201_vm5 = vweird.f32 %v1195_v12 }
 0x886   : > { %vm1206_vm7 = vcmp.eq.f32.partialorder %v1205_v18, 8.507059e+37  ;;  %v1208_v31 = vor.u32 1.1754944e-38, %v1207_v19 }
 0x887   : > { %v1088_v13 = vpop.xlane.xlu2 %1087 }
 0x888   : > { %1586 = vrcp.f32 %v1088_v13  ;;  %v1100_v9 = vand.u32 2147483648, %v1088_v13  ;;  %v1098_v27 = vand.u32 2147483647, %v1088_v13  ;;  %vm1094_vm9 = vweird.f32 %v1088_v13 }
 0x88a   : > { %v1585_v14 = vpop.eup %1584  ;;  %v1101_v30 = vor.u32 1.1754944e-38, %v1100_v9  ;;  %vm1099_vm11 = vcmp.eq.f32.partialorder %v1098_v27, 8.507059e+37 }
 0x88b   : > { %v1197_v15 = vmul.f32 %v1585_v14, %v1195_v12  ;;  %vm1202_vm4 = vweird.f32 %v1585_v14 }
 0x88c   : > { %vm1203_vm6 = vmor %vm1201_vm5, %vm1202_vm4 }
 0x88d   : > { %v1198_v16 = vsub.f32 1.0, %v1197_v15 }
 0x88e   : > { %v1587_v17 = vpop.eup %1586 }
 0x88f   : > { %v1199_v20 = vmul.f32 %v1585_v14, %v1198_v16  ;;  %v1090_v21 = vmul.f32 %v1587_v17, %v1088_v13  ;;  %v1212_v22 = vpop.permute.xlu2 %1211  ;;  %vm1095_vm8 = vweird.f32 %v1587_v17 }
 0x890   : > { %1232 = vmatpush.msra.mxu0 %v1212_v22  ;;  %vm1096_vm10 = vmor %vm1094_vm9, %vm1095_vm8 }
 0x891   : > { %v1200_v23 = vadd.f32 %v1585_v14, %v1199_v20  ;;  %v1091_v24 = vsub.f32 1.0, %v1090_v21 }
 0x893   : > { %v1204_v25 = vsel %vm1203_vm6, %v1585_v14, %v1200_v23  ;;  %v1092_v26 = vmul.f32 %v1587_v17, %v1091_v24 }
 0x894   : > { %v1209_v28 = vsel %vm1206_vm7, %v1208_v31, %v1204_v25 }
 0x895   : > { %v1210_v29 = vmul.f32 %v1581_v5, %v1209_v28  ;;  %v1093_v10 = vadd.f32 %v1587_v17, %v1092_v26 }
 0x897   : > { %v1097_v32 = vsel %vm1096_vm10, %v1587_v17, %v1093_v10  ;;  %1452 = vmatmul.msk.f32.vlgmr.msra.gmra.mxu0 %vm440_vm2, %v1210_v29 }
 0x898   : > { %v1102_v33 = vsel %vm1099_vm11, %v1101_v30, %v1097_v32 }
 0x899   : > { %v1103_v34 = vmul.f32 %v1583_v60, %v1102_v33 }
 0x89b   : > { %1447 = vmatmul.msk.f32.vlgmr.msrb.gmra.mxu1 %vm440_vm2, %v1103_v34 }
 0x914   : > { %v1234_v37 = vpop.f32.mrf.mxu0 }
 0x915   : > { %1454 = vmatmul.msk.f32.vlgmr.msra.gmra.mxu1 %vm412_vm1, %v1234_v37 }
 0x918   : > { %v1127_v38 = vpop.f32.mrf.mxu1 }
 0x919   : > { %1449 = vmatmul.msk.f32.vlgmr.msrb.gmra.mxu2 %vm412_vm1, %v1127_v38 }
 0x992   : > { %v1261_v41 = vpop.f32.mrf.mxu1 }
 0x99c   : > { %v1154_v39 = vpop.f32.mrf.mxu2 }
 0x99d   : > { %v1157_v40 = vadd.f32 %v1154_v39, %v2113_v55 }
 0x99f   : > { %v1264_v42 = vadd.f32 %v1261_v41, %v1157_v40 }
 0x9a1   : > { %v1265_v44 = vadd.f32 %v1264_v42, %v1998_v8 }
 0x9a3   : > { %v1270_v45 = vadd.f32 %v1555_v43, %v1265_v44 }
 0x9a5   : > { %1271 = vst.msk [vmem:[%s334_s1] sm:$0xff] %vm340_vm0, %v1270_v45 }
 0x9a6   : > { %1765 = shalt.err (!%p1762_p9)
}
 0x9a7   : > { %1477 = dma.vmem_to_hbm [thread:$0]  (%p1949_p4), %s1286_s29, 128, %s1288_s11, %s1273_s28  }
 0x9a8 PF: > { %s1299_s15 = sand.u32 1, %s1800_s21   ;;  %p2186_p10 = scmp.ge.s32.totalorder %s1812_s24, 2 }
 0x9a9   : > { %s1300_s19 = scalar_lea.sflag [#allocation4], %s1299_s15 }
 0x9aa   : > { %p1497_p13 = pnand %p2186_p10, %p1953_p6 }
 0x9ac   : > { %p1498_p11 = pneg %p1497_p13 }
 0x9ae   : > { %1795 = dma.done.wait (%p1498_p11), %s1300_s19, 128  }
 0x9af   : > { %1797 = vsyncadd (%p1498_p11), %s1300_s19, 4294967168  ;;  %p21_p0 = scmp.ge.s32.totalorder %s1923_s9, 4   ;;  %s2187_s21 = smov %s1804_s22 }
 0x9b0   : > { %s2188_s22 = smov %s1808_s23  ;;  %s2189_s23 = smov %s1934_s13 }
 0x9b1   : > { %s2190_s24 = smov %s1923_s9  ;;  %23 = sbr.rel (!%p21_p0) target bundleno = 9 (0x9), region = 105 }
 0x9b6   :  { %1306 = vsyncpa [#allocation3], 1 }
 0x9b7   :  { %1308 = vsyncpa [#allocation3 + $0x1], 1 }
 0x9b8   :  { %1309 = vsyncpa [#allocation6], 1 }
 0x9b9   :  { %1310 = vsyncpa [#allocation9], 1 }
 0x9ba   :  { %1311 = vsyncpa [#allocation4], 1 }
 0x9bb   :  { %1313 = vsyncpa [#allocation4 + $0x1], 1 }

</bundles_post_ra>
